<compile_context>
chip_gen: v7x
topology: tpu7x:2x2x1
jax: 0.10.0
libtpu: 0.0.40
codegen_flags: <defaults>
</compile_context>

<pallas_src>
import functools

import numpy as np
import jax
import jax.numpy as jnp
from jax import lax
from jax.experimental import pallas as pl
from jax.experimental.pallas import tpu as pltpu


# -----------------------------------------------------------------------------
# PPR matrix construction (mirrors calc_A_hat / calc_ppr_exact, dense numpy)
# -----------------------------------------------------------------------------
def calc_A_hat(adj_matrix: np.ndarray) -> np.ndarray:
    nnodes = adj_matrix.shape[0]
    A = adj_matrix + np.eye(nnodes, dtype=adj_matrix.dtype)
    D_vec = np.sum(A, axis=1)
    D_invsqrt = 1.0 / np.sqrt(D_vec)
    return (A * D_invsqrt[None, :]) * D_invsqrt[:, None]


def calc_ppr_exact(adj_matrix: np.ndarray, alpha: float) -> np.ndarray:
    nnodes = adj_matrix.shape[0]
    M = calc_A_hat(adj_matrix)
    A_inner = np.eye(nnodes, dtype=np.float64) - (1.0 - alpha) * M
    return (alpha * np.linalg.inv(A_inner)).astype(np.float32)


def _round_up(x: int, m: int) -> int:
    return (x + m - 1) // m * m


# -----------------------------------------------------------------------------
# Buffer preparation (done once at module construction, like register_buffer)
# -----------------------------------------------------------------------------
def prepare_ppr_buffer(ppr_mat: np.ndarray, tk_target: int = 1024):
    """Pad the precomputed PPR matrix's columns to a multiple of the K chunk.

    Host-side, one-time cost at construction (the matrix inverse above is far more
    expensive), so the per-forward path never copies the big (N, N) slab.
    Returns (mat_padded: (N, N_pad) f32 device array, tk).
    """
    N = ppr_mat.shape[0]
    tk_target = _round_up(max(tk_target, 128), 128)
    tk = min(tk_target, _round_up(N, 128))
    N_pad = _round_up(N, tk)
    mat_padded = np.zeros((N, N_pad), dtype=np.float32)
    mat_padded[:, :N] = np.asarray(ppr_mat, dtype=np.float32)
    return jnp.asarray(mat_padded), tk


# -----------------------------------------------------------------------------
# Pallas kernel: in-kernel row gather (HBM -> VMEM, double-buffered K chunks)
# followed by (tb, tk) @ (tk, tf) MXU accumulation directly into the out block.
# -----------------------------------------------------------------------------
def _ppr_gather_matmul_kernel(idx_ref, mat_hbm, rhs_ref, out_ref,
                              lhs_buf, copy_sem, *, tb, tk, nk):
    # idx_ref  : SMEM (B_pad,) int32   -- prefetched gather indices
    # mat_hbm  : HBM  (N, N_pad) f32   -- full exact-PPR matrix (never fully loaded)
    # rhs_ref  : VMEM (N_pad, tf) f32  -- predictions (resident across B tiles)
    # out_ref  : VMEM (tb, tf) f32     -- output block, accumulated in place
    # lhs_buf  : VMEM (2, tb, tk) f32  -- double-buffered gathered row chunks
    # copy_sem : DMA semaphores (2,)
    i = pl.program_id(1)          # B-tile index (inner / fast grid axis)
    row_base = i * tb

    def row_copy(kc, slot, r):
        row = idx_ref[row_base + r]
        k0 = pl.multiple_of(kc * tk, tk)
        return pltpu.make_async_copy(
            mat_hbm.at[pl.ds(row, 1), pl.ds(k0, tk)],
            lhs_buf.at[slot, pl.ds(r, 1)],
            copy_sem.at[slot],
        )

    def start_chunk(kc, slot):
        def body(r, carry):
            row_copy(kc, slot, r).start()
            return carry
        lax.fori_loop(0, tb, body, 0)

    def wait_chunk(kc, slot):
        def body(r, carry):
            row_copy(kc, slot, r).wait()
            return carry
        lax.fori_loop(0, tb, body, 0)

    # Prime the pipeline with chunk 0, zero the resident output block.
    start_chunk(0, 0)
    out_ref[...] = jnp.zeros_like(out_ref)

    @pl.loop(0, nk)
    def _(kc):
        slot = kc & 1

        @pl.when(kc + 1 < nk)
        def _():
            start_chunk(kc + 1, 1 - slot)      # prefetch next chunk

        wait_chunk(kc, slot)                   # wait for current chunk's tb rows
        k0 = pl.multiple_of(kc * tk, tk)
        out_ref[...] += jnp.dot(
            lhs_buf[slot],
            rhs_ref[pl.ds(k0, tk), :],
            preferred_element_type=jnp.float32,
        )


# -----------------------------------------------------------------------------
# Forward wrapper: out = ppr_mat[idx] @ predictions
# -----------------------------------------------------------------------------
def ppr_exact_forward(mat_padded: jnp.ndarray,
                      predictions: jnp.ndarray,
                      idx: jnp.ndarray,
                      *,
                      tk: int,
                      tb_target: int = 256,
                      tf_target: int = 256) -> jnp.ndarray:
    N, N_pad = mat_padded.shape
    assert tk % 128 == 0 and N_pad % tk == 0, "buffer must come from prepare_ppr_buffer"
    nk = N_pad // tk
    F = predictions.shape[1]
    B = idx.shape[0]

    # No runtime OOB checks on TPU DMAs; clip (PyTorch would raise on OOB idx).
    idx32 = jnp.clip(idx.astype(jnp.int32), 0, N - 1)

    # ---- tile sizes ----------------------------------------------------------
    F_pad = _round_up(F, 128)
    tf = min(_round_up(tf_target, 128), F_pad)
    F_pad = _round_up(F_pad, tf)

    B8 = _round_up(B, 8)
    tb = min(_round_up(tb_target, 8), B8)
    if B8 // tb < 2 and B8 >= 16:
        # Split the B axis so both v7x TensorCores get a tile (free here: the
        # gather reads each row once regardless and the RHS is VMEM-resident).
        tb = _round_up((B8 + 1) // 2, 8)
    B_pad = _round_up(B8, tb)

    # ---- small per-call pads (idx and the N x F predictions only) -----------
    idx_p = jnp.pad(idx32, (0, B_pad - B))                       # (B_pad,)
    rhs = jnp.pad(predictions.astype(jnp.float32),
                  ((0, N_pad - N), (0, F_pad - F)))              # (N_pad, F_pad)

    # ---- VMEM budget / cost hint --------------------------------------------
    vmem_bytes = 4 * (2 * tb * tk + 2 * N_pad * tf + 2 * tb * tf) + (2 << 20)
    vmem_limit = max(32 << 20, min(64 << 20, vmem_bytes))        # v7x-safe ceiling
    cost = pl.CostEstimate(
        flops=2 * B_pad * N_pad * F_pad,
        transcendentals=0,
        bytes_accessed=4 * (B_pad * N_pad + N_pad * F_pad + B_pad * F_pad),
    )

    kernel = functools.partial(_ppr_gather_matmul_kernel, tb=tb, tk=tk, nk=nk)

    out_padded = pl.pallas_call(
        kernel,
        out_shape=jax.ShapeDtypeStruct((B_pad, F_pad), jnp.float32),
        grid_spec=pltpu.PrefetchScalarGridSpec(
            num_scalar_prefetch=1,                     # idx -> SMEM
            grid=(F_pad // tf, B_pad // tb),           # (j, i): j outer so the
                                                       # resident RHS is DMA'd once per F tile
            in_specs=[
                pl.BlockSpec(memory_space=pl.ANY),                       # PPR matrix stays in HBM
                pl.BlockSpec((N_pad, tf), lambda j, i, idx: (0, j)),     # predictions (resident)
            ],
            out_specs=pl.BlockSpec((tb, tf), lambda j, i, idx: (i, j)),
            scratch_shapes=[
                pltpu.VMEM((2, tb, tk), jnp.float32),                    # gathered row chunks
                pltpu.SemaphoreType.DMA((2,)),
            ],
        ),
        compiler_params=pltpu.CompilerParams(
            dimension_semantics=("parallel", "parallel"),
            vmem_limit_bytes=vmem_limit,
        ),
        cost_estimate=cost,
    )(idx_p, mat_padded, rhs)

    return out_padded[:B, :F]


# -----------------------------------------------------------------------------
# Demo / correctness check
# -----------------------------------------------------------------------------
if __name__ == "__main__":
    key = jax.random.PRNGKey(0)
    k_adj, k_pred, k_idx = jax.random.split(key, 3)

    N = 200      # number of graph nodes (not a multiple of 128 -> exercises padding)
    F = 16       # feature / class dimension of predictions
    B = 48       # number of gathered index rows
    alpha = 0.1

    # Deterministic synthetic symmetric 0/1 adjacency (no self loops).
    upper = (jax.random.uniform(k_adj, (N, N)) < 0.1).astype(jnp.float32)
    adj = jnp.triu(upper, k=1)
    adj = adj + adj.T
    adj_np = np.asarray(adj, dtype=np.float64)

    # Precompute exact PPR matrix (the registered buffer `mat` in __init__) and
    # pad its columns once at construction time.  tk_target=128 here so the tiny
    # demo exercises the double-buffered K pipeline (production default: 1024).
    ppr_mat = calc_ppr_exact(adj_np, alpha)                              # (N, N) f32
    mat_padded, tk = prepare_ppr_buffer(ppr_mat, tk_target=128)          # (N, N_pad)

    predictions = jax.random.normal(k_pred, (N, F), dtype=jnp.float32)   # (N, F)
    idx = jax.random.permutation(k_idx, N)[:B].astype(jnp.int32)         # (B,)

    out = ppr_exact_forward(mat_padded, predictions, idx, tk=tk)
    out = jax.block_until_ready(out)
    assert out.shape == (B, F)

    # Reference forward (float64 numpy) for the semantics out = mat[idx] @ pred.
    ref = (np.asarray(ppr_mat, dtype=np.float64)[np.asarray(idx)]
           @ np.asarray(predictions, dtype=np.float64))
    np.testing.assert_allclose(np.asarray(out, dtype=np.float64), ref,
                               rtol=1e-3, atol=1e-3)

    print("KERNEL_OK")
</pallas_src>

<mosaic_0001>
module attributes {stable_mosaic.version = 11 : i64} {
  func.func @_ppr_gather_matmul_kernel(%arg0: i32, %arg1: i32, %arg2: memref<48xi32, #tpu.memory_space<smem>>, %arg3: memref<200x256xf32, #tpu.memory_space<any>>, %arg4: memref<256x128xf32, #tpu.memory_space<vmem>>, %arg5: memref<24x128xf32, #tpu.memory_space<vmem>>, %arg6: memref<2x24x128xf32, #tpu.memory_space<vmem>>, %arg7: memref<2x!tpu.dma_semaphore, #tpu.memory_space<semaphore_mem>>) attributes {dimension_semantics = [#tpu.dimension_semantics<parallel>, #tpu.dimension_semantics<parallel>], iteration_bounds = array<i64: 1, 2>, scalar_prefetch = 1 : i64, scratch_operands = 2 : i64, tpu.core_type = #tpu.core_type<tc>, window_params = [{}, {transform_indices = @transform_1, window_bounds = array<i64: 256, 128>}, {transform_indices = @transform_2, window_bounds = array<i64: 24, 128>}]} {
    %c24_i32 = arith.constant 24 : i32
    %0 = arith.muli %arg1, %c24_i32 : i32
    %c0_i32 = arith.constant 0 : i32
    %c24_i32_0 = arith.constant 24 : i32
    %1 = arith.addi %c0_i32, %c24_i32_0 : i32
    %c1_i32 = arith.constant 1 : i32
    scf.for %arg8 = %c0_i32 to %1 step %c1_i32  : i32 {
      %5 = arith.addi %0, %arg8 : i32
      %6 = arith.index_cast %5 : i32 to index
      %7 = memref.load %arg2[%6] : memref<48xi32, #tpu.memory_space<smem>>
      %c0_i32_6 = arith.constant 0 : i32
      %8 = tpu.assume_multiple %c0_i32_6, 128 : i32
      %c0_i32_7 = arith.constant 0 : i32
      %c0_i32_8 = arith.constant 0 : i32
      %9 = tpu.memref_slice %arg3[%7, %8] : memref<200x256xf32, #tpu.memory_space<any>> -> memref<1x128xf32, #tpu.memory_space<any>>
      %c0_i32_9 = arith.constant 0 : i32
      %10 = tpu.memref_slice %arg6[%c0_i32_7, %arg8, %c0_i32_9] : memref<2x24x128xf32, #tpu.memory_space<vmem>> -> memref<1x1x128xf32, #tpu.memory_space<vmem>>
      %11 = tpu.memref_squeeze %10 : memref<1x1x128xf32, #tpu.memory_space<vmem>> -> memref<1x128xf32, #tpu.memory_space<vmem>>
      %12 = tpu.memref_slice %arg7[%c0_i32_8] : memref<2x!tpu.dma_semaphore, #tpu.memory_space<semaphore_mem>> -> memref<1x!tpu.dma_semaphore, #tpu.memory_space<semaphore_mem>>
      %13 = tpu.memref_squeeze %12 : memref<1x!tpu.dma_semaphore, #tpu.memory_space<semaphore_mem>> -> memref<!tpu.dma_semaphore, #tpu.memory_space<semaphore_mem>>
      tpu.enqueue_dma source(%9 : memref<1x128xf32, #tpu.memory_space<any>>) target(%11 : memref<1x128xf32, #tpu.memory_space<vmem>>) target_semaphore(%13 : memref<!tpu.dma_semaphore, #tpu.memory_space<semaphore_mem>>)
    }
    %c24_i32_1 = arith.constant 24 : i32
    %cst = arith.constant 0.000000e+00 : f32
    %2 = vector.broadcast %cst : f32 to vector<24x128xf32>
    %c0 = arith.constant 0 : index
    %c0_2 = arith.constant 0 : index
    %3 = vector.load %arg5[%c0, %c0_2] : memref<24x128xf32, #tpu.memory_space<vmem>>, vector<24x128xf32>
    tpu.vector_store %arg5[%c0, %c0_2], %2 {strides = array<i32>} : memref<24x128xf32, #tpu.memory_space<vmem>>, vector<24x128xf32>,
    %c0_i32_3 = arith.constant 0 : i32
    %c2_i32 = arith.constant 2 : i32
    %4 = arith.addi %c0_i32_3, %c2_i32 : i32
    %c1_i32_4 = arith.constant 1 : i32
    scf.for %arg8 = %c0_i32_3 to %4 step %c1_i32_4  : i32 {
      %c1_i32_6 = arith.constant 1 : i32
      %5 = arith.muli %arg8, %c1_i32_6 : i32
      %c0_i32_7 = arith.constant 0 : i32
      %6 = arith.addi %c0_i32_7, %5 : i32
      %c1_i32_8 = arith.constant 1 : i32
      %7 = arith.andi %6, %c1_i32_8 : i32
      %c1_i32_9 = arith.constant 1 : i32
      %8 = arith.addi %6, %c1_i32_9 : i32
      %c2_i32_10 = arith.constant 2 : i32
      %9 = arith.cmpi slt, %8, %c2_i32_10 : i32
      %10 = arith.extui %9 : i1 to i32
      %c0_i32_11 = arith.constant 0 : i32
      %11 = arith.cmpi ne, %10, %c0_i32_11 : i32
      scf.if %11 {
        %c1_i32_24 = arith.constant 1 : i32
        %24 = arith.addi %6, %c1_i32_24 : i32
        %c1_i32_25 = arith.constant 1 : i32
        %25 = arith.subi %c1_i32_25, %7 : i32
        %c0_i32_26 = arith.constant 0 : i32
        %c24_i32_27 = arith.constant 24 : i32
        %26 = arith.addi %c0_i32_26, %c24_i32_27 : i32
        %c1_i32_28 = arith.constant 1 : i32
        scf.for %arg9 = %c0_i32_26 to %26 step %c1_i32_28  : i32 {
          %27 = arith.addi %0, %arg9 : i32
          %28 = arith.index_cast %27 : i32 to index
          %29 = memref.load %arg2[%28] : memref<48xi32, #tpu.memory_space<smem>>
          %c128_i32_30 = arith.constant 128 : i32
          %30 = arith.muli %24, %c128_i32_30 : i32
          %31 = tpu.assume_multiple %30, 128 : i32
          %32 = tpu.memref_slice %arg3[%29, %31] : memref<200x256xf32, #tpu.memory_space<any>> -> memref<1x128xf32, #tpu.memory_space<any>>
          %c0_i32_31 = arith.constant 0 : i32
          %33 = tpu.memref_slice %arg6[%25, %arg9, %c0_i32_31] : memref<2x24x128xf32, #tpu.memory_space<vmem>> -> memref<1x1x128xf32, #tpu.memory_space<vmem>>
          %34 = tpu.memref_squeeze %33 : memref<1x1x128xf32, #tpu.memory_space<vmem>> -> memref<1x128xf32, #tpu.memory_space<vmem>>
          %35 = tpu.memref_slice %arg7[%25] : memref<2x!tpu.dma_semaphore, #tpu.memory_space<semaphore_mem>> -> memref<1x!tpu.dma_semaphore, #tpu.memory_space<semaphore_mem>>
          %36 = tpu.memref_squeeze %35 : memref<1x!tpu.dma_semaphore, #tpu.memory_space<semaphore_mem>> -> memref<!tpu.dma_semaphore, #tpu.memory_space<semaphore_mem>>
          tpu.enqueue_dma source(%32 : memref<1x128xf32, #tpu.memory_space<any>>) target(%34 : memref<1x128xf32, #tpu.memory_space<vmem>>) target_semaphore(%36 : memref<!tpu.dma_semaphore, #tpu.memory_space<semaphore_mem>>)
        }
        %c24_i32_29 = arith.constant 24 : i32
      } else {
      }
      %c0_i32_12 = arith.constant 0 : i32
      %c24_i32_13 = arith.constant 24 : i32
      %12 = arith.addi %c0_i32_12, %c24_i32_13 : i32
      %c1_i32_14 = arith.constant 1 : i32
      scf.for %arg9 = %c0_i32_12 to %12 step %c1_i32_14  : i32 {
        %24 = arith.addi %0, %arg9 : i32
        %25 = arith.index_cast %24 : i32 to index
        %26 = memref.load %arg2[%25] : memref<48xi32, #tpu.memory_space<smem>>
        %c128_i32_24 = arith.constant 128 : i32
        %27 = arith.muli %6, %c128_i32_24 : i32
        %28 = tpu.assume_multiple %27, 128 : i32
        %29 = tpu.memref_slice %arg3[%26, %28] : memref<200x256xf32, #tpu.memory_space<any>> -> memref<1x128xf32, #tpu.memory_space<any>>
        %c0_i32_25 = arith.constant 0 : i32
        %30 = tpu.memref_slice %arg6[%7, %arg9, %c0_i32_25] : memref<2x24x128xf32, #tpu.memory_space<vmem>> -> memref<1x1x128xf32, #tpu.memory_space<vmem>>
        %31 = tpu.memref_squeeze %30 : memref<1x1x128xf32, #tpu.memory_space<vmem>> -> memref<1x128xf32, #tpu.memory_space<vmem>>
        %32 = tpu.memref_slice %arg7[%7] : memref<2x!tpu.dma_semaphore, #tpu.memory_space<semaphore_mem>> -> memref<1x!tpu.dma_semaphore, #tpu.memory_space<semaphore_mem>>
        %33 = tpu.memref_squeeze %32 : memref<1x!tpu.dma_semaphore, #tpu.memory_space<semaphore_mem>> -> memref<!tpu.dma_semaphore, #tpu.memory_space<semaphore_mem>>
        tpu.wait_dma2 semaphore(%33 : memref<!tpu.dma_semaphore, #tpu.memory_space<semaphore_mem>>) src(%29 : memref<1x128xf32, #tpu.memory_space<any>>) dst(%31 : memref<1x128xf32, #tpu.memory_space<vmem>>)
      }
      %c24_i32_15 = arith.constant 24 : i32
      %c128_i32 = arith.constant 128 : i32
      %13 = arith.muli %6, %c128_i32 : i32
      %14 = tpu.assume_multiple %13, 128 : i32
      %c0_16 = arith.constant 0 : index
      %c0_17 = arith.constant 0 : index
      %15 = vector.load %arg5[%c0_16, %c0_17] : memref<24x128xf32, #tpu.memory_space<vmem>>, vector<24x128xf32>
      %16 = arith.index_cast %7 : i32 to index
      %c0_18 = arith.constant 0 : index
      %c0_19 = arith.constant 0 : index
      %17 = vector.load %arg6[%16, %c0_18, %c0_19] : memref<2x24x128xf32, #tpu.memory_space<vmem>>, vector<1x24x128xf32>
      %18 = vector.shape_cast %17 : vector<1x24x128xf32> to vector<24x128xf32>
      %19 = arith.index_cast %14 : i32 to index
      %c0_20 = arith.constant 0 : index
      %20 = vector.load %arg4[%19, %c0_20] : memref<256x128xf32, #tpu.memory_space<vmem>>, vector<128x128xf32>
      %cst_21 = arith.constant dense<0.000000e+00> : vector<24x128xf32>
      %21 = tpu.matmul %18, %20, %cst_21 {dimension_numbers = #tpu.dot_dimension_numbers<[1], [0], [0], [1], [0, 0, 1, 1], [], []>} : vector<24x128xf32>, vector<128x128xf32>, vector<24x128xf32> -> vector<24x128xf32>
      %22 = arith.addf %15, %21 : vector<24x128xf32>
      %c0_22 = arith.constant 0 : index
      %c0_23 = arith.constant 0 : index
      %23 = vector.load %arg5[%c0_22, %c0_23] : memref<24x128xf32, #tpu.memory_space<vmem>>, vector<24x128xf32>
      tpu.vector_store %arg5[%c0_22, %c0_23], %22 {strides = array<i32>} : memref<24x128xf32, #tpu.memory_space<vmem>>, vector<24x128xf32>,
    }
    %c2_i32_5 = arith.constant 2 : i32
    return
  }
  func.func @transform_1(%arg0: i32, %arg1: i32, %arg2: memref<48xi32, #tpu.memory_space<smem>>) -> (i32, i32) {
    %c0_i32 = arith.constant 0 : i32
    %c0_i32_0 = arith.constant 0 : i32
    return %c0_i32, %arg0 : i32, i32
  }
  func.func @transform_2(%arg0: i32, %arg1: i32, %arg2: memref<48xi32, #tpu.memory_space<smem>>) -> (i32, i32) {
    %c0_i32 = arith.constant 0 : i32
    return %arg1, %arg0 : i32, i32
  }
}

</mosaic_0001>

<bundles_post_ra>
// kernel: tpu_custom_call.1
= control target key start
LH: loop header
LB: loop body
LE: loop exit
PB: predicated region body
PF: predicated region fallthrough
CT: control target
= control target key end

     0   :  { %s1238_s0 = inlined_call_operand.hbm [shape: s32[48], index: 0, kind: input, shape index: {}]   ;;  %s1239_s1 = inlined_call_operand.hbm [shape: f32[200,256], index: 1, kind: input, shape index: {}]   ;;  %s1240_s2 = inlined_call_operand.hbm [shape: f32[256,128], index: 2, kind: input, shape index: {}]   ;;  %s1241_s3 = inlined_call_operand.hbm [shape: f32[48,128], index: 3, kind: output, shape index: {}]  }
   0x1   :  { %1257 = sst [smem:[#allocation27_spill]] %s1240_s2  ;;  %s714_s14 = scalar_lea.hbm %s1238_s0, 16 }
   0x2   :  { %p715_p0 = scmp.ne.s32.totalorder %s1238_s0, %s714_s14  ;;  %p718_p1 = scmp.lt.u32.totalorder %s714_s14, %s1238_s0 }
   0x4   :  { %p720_p2 = pnand %p718_p1, %p715_p0 }
   0x6   :  { %723 = shalt.err (!%p720_p2)  }
   0x7   :  { %s920_s19 = smov [#allocation5]  }
   0x8   :  { %9 = dma.hbm_to_smem %s1238_s0, 16, %s920_s19, [#allocation4] }
   0x9   :  { %868 = dma.done.wait [#allocation4], 16 }
   0xa   :  { %869 = vsyncadd [#allocation4], 4294967280 }
   0xb   :  { %11 = sfence }
   0xc   :  { %12 = vsyncpa [#allocation7], 0 }
   0xd   :  { %13 = vsyncpa [#allocation8], 0 }
   0xe   :  { %15 = vsyncpa [#allocation8 + $0x1], 0  ;;  %s964_s22 = smov 0   ;;  %s966_s23 = smov 0  }
   0xf   :  { %s968_s24 = smov 0   ;;  %s970_s25 = smov 0  }
  0x10   :  { %s972_s26 = smov 0   ;;  %s974_s27 = smov 0  }
  0x11 LB: > { %1258 = sst [smem:[#allocation20_spill]] %s882_s22  ;;  %s484_s0 = sadd.s32 4294967295, %s902_s27   ;;  %s902_s27 = sphi %s974_s27, %s21_s27   ;;  %s898_s26 = sphi %s972_s26, %s1288_s26   ;;  %s894_s25 = sphi %s970_s25, %s1287_s25   ;;  %s890_s24 = sphi %s968_s24, %s1286_s24   ;;  %s886_s23 = sphi %s966_s23, %s1290_s23   ;;  %s882_s22 = sphi %s964_s22, %s1289_s22  }
  0x12   : > { %1259 = sst [smem:[#allocation21_spill]] %s890_s24  ;;  %s485_s28 = sadd.s32 4294967294, %s902_s27  }
  0x13   : > { %1260 = sst [smem:[#allocation22_spill]] %s898_s26  ;;  %s30_s29 = sadd.s32 1, %s898_s26 }
  0x14   : > { %1261 = sst [smem:[#allocation23_spill]] %s902_s27  ;;  %s68_s30 = sadd.s32 1, %s890_s24 }
  0x15   : > { %p31_p3 = scmp.ge.s32.totalorder %s30_s29, 2  ;;  %p78_p4 = scmp.ne.s32.totalorder %s890_s24, %s886_s23 }
  0x16   : > { %p79_p5 = scmp.eq.s32.totalorder %s484_s0, 1  ;;  %p84_p6 = scmp.ne.s32.totalorder %s886_s23, %s882_s22 }
  0x17   : > { %s1292_s29 = smov (%p31_p3, %s30_s29), 0  ;;  %p85_p8 = scmp.eq.s32.totalorder %s485_s28, 1 }
  0x18   : > { %1262 = sst [smem:[#allocation24_spill]] %s1292_s29  ;;  %p1004_p7 = por %p79_p5, %p78_p4 }
  0x19   : > { %s63_s5 = ssub.s32 %s898_s26, %s1292_s29  ;;  %p486_p9 = scmp.ge.s32.totalorder %s902_s27, 1 }
  0x1a   : > { %s1263_s4 = scalar_select %p1004_p7, 1, 0 }
  0x1b   : > { %p66_p10 = scmp.eq.s32.totalorder %s63_s5, 0  ;;  %p1011_p11 = por %p85_p8, %p84_p6 }
  0x1c   : > { %p92_p12 = scmp.lt.s32.totalorder %s902_s27, 3  ;;  %p1023_p0 = scmp.eq.s32.totalorder %s484_s0, 0 }
  0x1d   : > { %s1264_s6 = scalar_select %p1011_p11, 1, 0 }
  0x1e   : > { %s1017_s7 = scalar_select %p66_p10, %s890_s24, %s68_s30  }
  0x1f   : > { %1265 = sst [smem:[#allocation25_spill]] %s1264_s6  ;;  %p1019_p13 = pnand %p486_p9, %p92_p12 }
  0x20   : > { %1266 = sst [smem:[#allocation26_spill]] %s1017_s7  ;;  %s921_s10 = smov [#allocation6]  }
  0x21   : > { %s1267_s8 = scalar_select %p1019_p13, 1, 0 }
  0x22   : > { %s1268_s9 = scalar_select %p1023_p0, 1, 0 }
  0x23   : > { %p613_p1 = pneg %p1019_p13  ;;  %s106_s11 = sshll.u32 %s921_s10, 4  ;;  %s107_s11 = int_to_ptr.vmem [resolvable:$true] %s106_s11 }
  0x24   : > { %s1270_s2 = sld [smem:[#allocation27_spill]] }
  0x25   : > { %p1031_p2 = pnand %p1023_p0, %p613_p1 }
  0x27   : > { %p726_p4 = pneg %p1031_p2 }
  0x2a   : > { %s724_s15 = scalar_lea.hbm %s1270_s2, 4096 }
  0x2b   : > { %p725_p3 = scmp.ne.s32.totalorder %s1270_s2, %s724_s15  ;;  %p731_p8 = scmp.lt.u32.totalorder %s724_s15, %s1270_s2 }
  0x2d   : > { %p727_p5 = pnand %p726_p4, %p725_p3 }
  0x2f   : > { %p728_p6 = pneg %p727_p5 }
  0x31   : > { %p733_p9 = pnand %p731_p8, %p728_p6 }
  0x33   : > { %736 = shalt.err (!%p733_p9)
}
  0x34   : > { %s737_s20 = scalar_lea.vmem %s107_s11, 4096  ;;  %p745_p11 = scmp.lt.s32.totalorder %s107_s11, %s107_s11 }
  0x35   : > { %p738_p10 = scmp.ne.s32.totalorder %s107_s11, %s737_s20  ;;  %p746_p7 = scmp.lt.s32.totalorder %s737_s20, %s737_s20 }
  0x37   : > { %p740_p12 = pnand %p738_p10, %p726_p4  ;;  %p747_p0 = por %p746_p7, %p745_p11 }
  0x39   : > { %p741_p1 = pneg %p740_p12 }
  0x3b   : > { %p748_p13 = pnand %p747_p0, %p741_p1 }
  0x3d   : > { %751 = shalt.err (!%p748_p13)
}
  0x3e   : > { %s922_s21 = smov 128   ;;  %s923_s0 = smov 8  }
  0x3f   : > { %616 = dma.hbm_to_vmem [thread:$0]  (!%p1031_p2), %s1270_s2, 4096, %s107_s11, [#allocation7], %s922_s21, %s922_s21, %s923_s0  }
  0x40   : > { %p1271_p3 = scmp.ne.s32.totalorder %s1267_s8, 0 }
  0x41   : > { %p1272_p5 = scmp.ne.s32.totalorder (!%p1271_p3), %s1268_s9, 0 }
  0x42   : > { %122 = sbr.rel (%p1271_p3) target bundleno = 460 (0x1cc), region = 24 }
  0x49   : > { %871 = dma.done.wait (%p1272_p5), [#allocation7], 4096  }
  0x4a   : > { %873 = vsyncadd (%p1272_p5), [#allocation7], 4294963200  ;;  %s1246_s5 = sand.u32 1, %s886_s23   ;;  %s1063_s14 = smov 0  }
  0x4b   : > { %s606_s12 = smul.u32 24, %s1246_s5 }
  0x4d   : > { %s1061_s13 = scalar_lea.vmem [#allocation9], %s606_s12 }
  0x4e LB: >> { %s1273_s10 = smul.u32 24, %s894_s25  ;;  %s155_s11 = scalar_lea.vmem [#allocation2], %s906_s14  ;;  %s906_s14 = sphi %s1063_s14, %s144_s14  }
  0x4f   : >> { %s163_s15 = sshll.u32 %s155_s11, 4  ;;  %s1249_s2 = scalar_lea.hbm %s1239_s1, 6400  ;;  %s164_s15 = int_to_ptr.vmem [resolvable:$true] %s163_s15 }
  0x50   : >> { %s145_s8 = sadd.s32 %s906_s14, %s1273_s10 }
  0x51   : >> { %s146_s9 = sld [smem:[#allocation5 + %s145_s8]] }
  0x57   : >> { %s147_s16 = sshrl.u32 %s146_s9, 3  ;;  %s148_s17 = sand.u32 7, %s146_s9  }
  0x58   : >> { %s490_s18 = sshll.u32 %s147_s16, 4 }
  0x59   : >> { %s150_s19 = sadd.s32 %s490_s18, %s148_s17 }
  0x5a   : >> { %s491_s20 = sshll.u32 %s150_s19, 4 }
  0x5b   : >> { %s154_s28 = scalar_lea.hbm %s1239_s1, %s491_s20 }
  0x5c   : >> { %s752_s30 = scalar_lea.hbm %s154_s28, 16  ;;  %p755_p11 = scmp.lt.u32.totalorder %s154_s28, %s1239_s1 }
  0x5d   : >> { %p753_p7 = scmp.ne.s32.totalorder %s154_s28, %s752_s30  ;;  %p756_p13 = scmp.lt.u32.totalorder %s1249_s2, %s752_s30 }
  0x5e   : >> { %p758_p2 = scmp.lt.u32.totalorder %s752_s30, %s154_s28 }
  0x5f   : >> { %p757_p0 = por %p756_p13, %p755_p11 }
  0x61   : >> { %p759_p4 = por %p758_p2, %p757_p0 }
  0x63   : >> { %p760_p6 = pnand %p759_p4, %p753_p7 }
  0x65   : >> { %763 = shalt.err (!%p760_p6)  }
  0x66   : >> { %s764_s16 = scalar_lea.vmem %s164_s15, 16  ;;  %s924_s17 = smov [#allocation2]  }
  0x67   : >> { %p765_p8 = scmp.ne.s32.totalorder %s164_s15, %s764_s16  ;;  %s766_s18 = sshll.u32 %s924_s17, 4  ;;  %s1085_s18 = int_to_ptr.vmem [resolvable:$false] %s766_s18 }
  0x68   : >> { %s1248_s5 = scalar_lea.vmem %s1085_s18, 768  ;;  %p769_p9 = scmp.lt.s32.totalorder %s164_s15, %s1085_s18 }
  0x69   : >> { %p770_p10 = scmp.lt.s32.totalorder %s1248_s5, %s764_s16 }
  0x6b   : >> { %p771_p12 = por %p770_p10, %p769_p9 }
  0x6d   : >> { %p772_p1 = pnand %p771_p12, %p765_p8 }
  0x6f   : >> { %775 = shalt.err (!%p772_p1)  }
  0x70   : >> { %166 = dma.hbm_to_vmem [thread:$0]  %s154_s28, 16, %s164_s15, [#allocation3] }
  0x71   : >> { %s144_s14 = sadd.s32 1, %s906_s14  }
  0x72   : >> { %p141_p3 = scmp.ge.s32.totalorder %s144_s14, 24  }
  0x73   : > { %v925_v0 = vmov (%p141_p3), 0.0   ;;  %s1097_s10 = smov (%p141_p3), 0  }
  0x74   : > { %143 = sbr.rel (!%p141_p3) target bundleno = 78 (0x4e), region = 111  ;;  %167 = vst [vmem:[%s1061_s13] sm:$0xff] (%p141_p3), %v925_v0  ;;  %168 = vst [vmem:[%s1061_s13 + $0x8] sm:$0xff] (%p141_p3), %v925_v0 }
  0x75   : > { %169 = vst [vmem:[%s1061_s13 + $0x10] sm:$0xff] (%p141_p3), %v925_v0 }
  0x7b LB: >> { %s1103_s15 = sand.u32 1, %s910_s10  ;;  %s1247_s14 = sadd.s32 1, %s910_s10   ;;  %s910_s10 = sphi %s1097_s10, %s1278_s10  }
  0x7c   : >> { %p1108_p5 = scmp.ge.s32.totalorder %s1247_s14, 2 }
  0x7d   : >> { %s182_s20 = ssub.s32 (!%p1108_p5), 1, %s1103_s15  ;;  %s1115_s21 = smov (!%p1108_p5), 0  }
  0x7e   : >> { %181 = sbr.rel (%p1108_p5) target bundleno = 178 (0xb2), region = 50 }
  0x85 LB: >>> { %s503_s0 = sshll.u32 %s910_s10, 7  ;;  %s1275_s28 = smul.u32 24, %s894_s25  ;;  %s914_s21 = sphi %s1115_s21, %s188_s21  }
  0x86   : >>> { %s504_s12 = sadd.s32 128, %s503_s0  ;;  %s202_s11 = smul.u32 24, %s182_s20 }
  0x87   : >>> { %s189_s30 = sadd.s32 %s914_s21, %s1275_s28  ;;  %s196_s9 = sshra.s32 %s504_s12, 7 }
  0x88   : >>> { %s190_s8 = sld [smem:[#allocation5 + %s189_s30]]  ;;  %s203_s16 = sadd.s32 %s914_s21, %s202_s11 }
  0x89   : >>> { %s495_s17 = sshll.u32 %s196_s9, 3  ;;  %s204_s14 = scalar_lea.vmem [#allocation2], %s203_s16 }
  0x8a   : >>> { %s213_s5 = sshll.u32 %s204_s14, 4  ;;  %s205_s28 = scalar_lea.sflag [#allocation3], %s182_s20  ;;  %s214_s5 = int_to_ptr.vmem [resolvable:$true] %s213_s5 }
  0x8e   : >>> { %s192_s2 = sshrl.u32 %s190_s8, 3  ;;  %s193_s29 = sand.u32 7, %s190_s8  }
  0x8f   : >>> { %s494_s26 = sshll.u32 %s192_s2, 4  ;;  %s1276_s2 = scalar_lea.hbm %s1239_s1, 6400 }
  0x90   : >>> { %s195_s7 = sadd.s32 %s494_s26, %s193_s29 }
  0x91   : >>> { %s199_s24 = sadd.s32 %s495_s17, %s195_s7 }
  0x92   : >>> { %s496_s6 = sshll.u32 %s199_s24, 4 }
  0x93   : >>> { %s201_s0 = scalar_lea.hbm %s1239_s1, %s496_s6 }
  0x94   : >>> { %s776_s30 = scalar_lea.hbm %s201_s0, 16  ;;  %p779_p11 = scmp.lt.u32.totalorder %s201_s0, %s1239_s1 }
  0x95   : >>> { %p777_p7 = scmp.ne.s32.totalorder %s201_s0, %s776_s30  ;;  %p780_p13 = scmp.lt.u32.totalorder %s1276_s2, %s776_s30 }
  0x96   : >>> { %p782_p2 = scmp.lt.u32.totalorder %s776_s30, %s201_s0 }
  0x97   : >>> { %p781_p0 = por %p780_p13, %p779_p11 }
  0x99   : >>> { %p783_p4 = por %p782_p2, %p781_p0 }
  0x9b   : >>> { %p784_p6 = pnand %p783_p4, %p777_p7 }
  0x9d   : >>> { %787 = shalt.err (!%p784_p6)  }
  0x9e   : >>> { %s788_s22 = scalar_lea.vmem %s214_s5, 16  ;;  %p793_p9 = scmp.lt.s32.totalorder %s214_s5, %s1085_s18 }
  0x9f   : >>> { %p789_p8 = scmp.ne.s32.totalorder %s214_s5, %s788_s22  ;;  %s1277_s24 = scalar_lea.vmem %s1085_s18, 768 }
  0xa0   : >>> { %p794_p10 = scmp.lt.s32.totalorder %s1277_s24, %s788_s22 }
  0xa2   : >>> { %p795_p12 = por %p794_p10, %p793_p9 }
  0xa4   : >>> { %p796_p1 = pnand %p795_p12, %p789_p8 }
  0xa6   : >>> { %799 = shalt.err (!%p796_p1)  }
  0xa7   : >>> { %216 = dma.hbm_to_vmem [thread:$0]  %s201_s0, 16, %s214_s5, %s205_s28 }
  0xa8   : >>> { %s188_s21 = sadd.s32 1, %s914_s21  }
  0xa9   : >>> { %p185_p3 = scmp.ge.s32.totalorder %s188_s21, 24  }
  0xab   : >> { %187 = sbr.rel (!%p185_p3) target bundleno = 133 (0x85), region = 122 }
  0xb2 PF: >> { %s916_s26 = smov 0  }
  0xb3 LB: >>> { %s226_s27 = scalar_lea.sflag [#allocation3], %s1103_s15  ;;  %s918_s26 = sphi %s916_s26, %s222_s26  }
  0xb4   : >>> { %874 = dma.done.wait %s226_s27, 16 }
  0xb5   : >>> { %875 = vsyncadd %s226_s27, 4294967280  ;;  %s222_s26 = sadd.s32 1, %s918_s26  }
  0xb6   : >>> { %p219_p7 = scmp.ge.s32.totalorder %s222_s26, 24  }
  0xb7   : >> { %s497_s29 = sshll.u32 (%p219_p7), %s910_s10, 7  ;;  %v926_v1 = vmov (%p219_p7), 0.0|0.0   ;;  %vm927_vm0 = vmmov (%p219_p7), 0   ;;  %v928_v5 = vmov (%p219_p7), 0.0   ;;  %s234_s7 = smul.u32 (%p219_p7), 24, %s1103_s15  ;;  %v232_v30 = vld [vmem:[%s1061_s13 + $0x8] sm:$0xff] (%p219_p7) }
  0xb8   : >> { %221 = sbr.rel (!%p219_p7) target bundleno = 179 (0xb3), region = 133  ;;  %590 = vmatprep.subr.bf16.mxu1 (%p219_p7), %v926_v1  ;;  %566 = vmatprep.subr.bf16.mxu0 (%p219_p7), %v926_v1  ;;  %s1147_s6 = scalar_lea.vmem (%p219_p7), [#allocation6], %s497_s29  ;;  %v231_v31 = vld [vmem:[%s1061_s13] sm:$0xff] (%p219_p7)  ;;  %v233_v38 = vld [vmem:[%s1061_s13 + $0x10] sm:$0xff] (%p219_p7) }
  0xb9   : >> { %v240_v2 = vld [vmem:[%s1147_s6] sm:$0xff] (%p219_p7)  ;;  %v241_v3 = vld [vmem:[%s1147_s6 + $0x8] sm:$0xff] (%p219_p7)  ;;  %v242_v4 = vld [vmem:[%s1147_s6 + $0x10] sm:$0xff] (%p219_p7)  ;;  %560 = vmatprep.mubr.msk.f32.mxu1 (%p219_p7), %vm927_vm0, %v928_v5  ;;  %557 = vmatprep.mubr.msk.f32.mxu0 (%p219_p7), %vm927_vm0, %v928_v5  ;;  %s235_s5 = scalar_lea.vmem (%p219_p7), [#allocation2], %s234_s7  ;;  %s1278_s10 = sadd.s32 (%p219_p7), 1, %s910_s10  }
  0xba   : >> { %v567_v6 = vpack.c.bf16 (%p219_p7), %v241_v3, %v240_v2  ;;  %v243_v7 = vld [vmem:[%s1147_s6 + $0x18] sm:$0xff] (%p219_p7)  ;;  %v244_v9 = vld [vmem:[%s1147_s6 + $0x20] sm:$0xff] (%p219_p7)  ;;  %v245_v10 = vld [vmem:[%s1147_s6 + $0x28] sm:$0xff] (%p219_p7) }
  0xbb   : >> { %v570_v8 = vpack.c.bf16 (%p219_p7), %v243_v7, %v242_v4  ;;  %v573_v11 = vpack.c.bf16 (%p219_p7), %v245_v10, %v244_v9  ;;  %v246_v12 = vld [vmem:[%s1147_s6 + $0x30] sm:$0xff] (%p219_p7)  ;;  %v247_v13 = vld [vmem:[%s1147_s6 + $0x38] sm:$0xff] (%p219_p7)  ;;  %v248_v15 = vld [vmem:[%s1147_s6 + $0x40] sm:$0xff] (%p219_p7) }
  0xbc   : >> { %598 = vmatpush3.bf16.msra.mxu1 (%p219_p7), %v567_v6  ;;  %568 = vmatpush3.bf16.msra.mxu0 (%p219_p7), %v567_v6  ;;  %v576_v14 = vpack.c.bf16 (%p219_p7), %v247_v13, %v246_v12  ;;  %v249_v16 = vld [vmem:[%s1147_s6 + $0x48] sm:$0xff] (%p219_p7)  ;;  %v250_v18 = vld [vmem:[%s1147_s6 + $0x50] sm:$0xff] (%p219_p7)  ;;  %v251_v19 = vld [vmem:[%s1147_s6 + $0x58] sm:$0xff] (%p219_p7) }
  0xbd   : >> { %591 = vmatprep.subr.bf16.mxu1 (%p219_p7), %v926_v1  ;;  %569 = vmatprep.subr.bf16.mxu0 (%p219_p7), %v926_v1  ;;  %v579_v17 = vpack.c.bf16 (%p219_p7), %v249_v16, %v248_v15  ;;  %v582_v20 = vpack.c.bf16 (%p219_p7), %v251_v19, %v250_v18  ;;  %v252_v21 = vld [vmem:[%s1147_s6 + $0x60] sm:$0xff] (%p219_p7)  ;;  %v253_v22 = vld [vmem:[%s1147_s6 + $0x68] sm:$0xff] (%p219_p7)  ;;  %v254_v24 = vld [vmem:[%s1147_s6 + $0x70] sm:$0xff] (%p219_p7) }
  0xbe   : >> { %v585_v23 = vpack.c.bf16 (%p219_p7), %v253_v22, %v252_v21  ;;  %v255_v25 = vld [vmem:[%s1147_s6 + $0x78] sm:$0xff] (%p219_p7)  ;;  %v237_v27 = vld [vmem:[%s235_s5 + $0x8] sm:$0xff] (%p219_p7)  ;;  %v238_v29 = vld [vmem:[%s235_s5 + $0x10] sm:$0xff] (%p219_p7) }
  0xbf   : >> { %v588_v26 = vpack.c.bf16 %v255_v25, %v254_v24  ;;  %v236_v28 = vld [vmem:[%s235_s5] sm:$0xff]  ;;  %s505_s15 = smul.u32 (%p1108_p5), 384, %s894_s25  ;;  %s357_s20 = sshll.u32 (%p1108_p5), %s1061_s13, 4  ;;  %s1188_s20 = int_to_ptr.vmem [resolvable:$true] %s357_s20 }
  0xc0   : >> { %599 = vmatpush3.bf16.msra.mxu1 %v570_v8  ;;  %571 = vmatpush3.bf16.msra.mxu0 %v570_v8  ;;  %s1279_s17 = sand.u32 (%p1108_p5), 1, %s886_s23   ;;  %s800_s19 = scalar_lea.vmem (%p1108_p5), %s1188_s20, 384 }
  0xc1   : >> { %592 = vmatprep.subr.bf16.mxu1 %v926_v1  ;;  %572 = vmatprep.subr.bf16.mxu0 %v926_v1  ;;  %s1186_s16 = scalar_lea.hbm (%p1108_p5), %s1241_s3, %s505_s15  ;;  %s1192_s10 = scalar_lea.sflag (%p1108_p5), [#allocation8], %s1279_s17 }
  0xc2   : > { %p1280_p11 = scmp.ne.s32.totalorder (%p1108_p5), %s1263_s4, 0  ;;  %s929_s25 = smov (%p1108_p5), [#allocation9]  }
  0xc4   : >> { %600 = vmatpush3.bf16.msra.mxu1 %v573_v11  ;;  %574 = vmatpush3.bf16.msra.mxu0 %v573_v11 }
  0xc5   : >> { %593 = vmatprep.subr.bf16.mxu1 %v926_v1  ;;  %575 = vmatprep.subr.bf16.mxu0 %v926_v1 }
  0xc8   : >> { %601 = vmatpush3.bf16.msra.mxu1 %v576_v14  ;;  %577 = vmatpush3.bf16.msra.mxu0 %v576_v14 }
  0xc9   : >> { %594 = vmatprep.subr.bf16.mxu1 %v926_v1  ;;  %578 = vmatprep.subr.bf16.mxu0 %v926_v1 }
  0xcc   : >> { %602 = vmatpush3.bf16.msra.mxu1 %v579_v17  ;;  %580 = vmatpush3.bf16.msra.mxu0 %v579_v17 }
  0xcd   : >> { %595 = vmatprep.subr.bf16.mxu1 %v926_v1  ;;  %581 = vmatprep.subr.bf16.mxu0 %v926_v1 }
  0xd0   : >> { %603 = vmatpush3.bf16.msra.mxu1 %v582_v20  ;;  %583 = vmatpush3.bf16.msra.mxu0 %v582_v20 }
  0xd1   : >> { %596 = vmatprep.subr.bf16.mxu1 %v926_v1  ;;  %584 = vmatprep.subr.bf16.mxu0 %v926_v1 }
  0xd4   : >> { %604 = vmatpush3.bf16.msra.mxu1 %v585_v23  ;;  %586 = vmatpush3.bf16.msra.mxu0 %v585_v23 }
  0xd5   : >> { %597 = vmatprep.subr.bf16.mxu1 %v926_v1  ;;  %587 = vmatprep.subr.bf16.mxu0 %v926_v1 }
  0xd8   : >> { %605 = vmatpush3.bf16.msra.mxu1 %v588_v26  ;;  %589 = vmatpush3.bf16.msra.mxu0 %v588_v26 }
  0xdb   : >> { %561 = vmatmul.mubr.f32.vlgmr.msra.gmra.mrb[0].mxu1 %v237_v27  ;;  %558 = vmatmul.mubr.f32.vlgmr.msra.gmra.mrb[0].mxu0 %v236_v28 }
  0xdc   : >> { %563 = vmatprep.mubr.msk.f32.mxu1 %vm927_vm0, %v928_v5 }
  0xdf   : >> { %564 = vmatmul.mubr.f32.gmra.mrb[2].mxu1 %v238_v29 }
 0x1ae   : >> { %v327_v32 = vpop.f32.mrb[0].mxu1  ;;  %v322_v33 = vpop.f32.mrb[0].mxu0 }
 0x1af   : >> { %v337_v34 = vadd.f32 %v327_v32, %v232_v30  ;;  %v562_v35 = vpop.f32.mrb[1].mxu1  ;;  %v336_v36 = vadd.f32 %v322_v33, %v231_v31  ;;  %v559_v37 = vpop.f32.mrb[1].mxu0  ;;  %174 = sbr.rel (!%p1108_p5) target bundleno = 123 (0x7b), region = 144  ;;  %p801_p5 = scmp.ne.s32.totalorder (%p1108_p5), %s1188_s20, %s800_s19 }
 0x1b1   : >> { %340 = vst [vmem:[%s1061_s13 + $0x8] sm:$0xff] %v337_v34  ;;  %339 = vst [vmem:[%s1061_s13] sm:$0xff] %v336_v36 }
 0x1b2   : >> { %v332_v39 = vpop.f32.mrb[2].mxu1 }
 0x1b3   : >> { %v338_v40 = vadd.f32 %v332_v39, %v233_v38  ;;  %v565_v41 = vpop.f32.mrb[3].mxu1 }
 0x1b5   : >> { %341 = vst [vmem:[%s1061_s13 + $0x10] sm:$0xff] %v338_v40 }
 0x1b6   : > { %p802_p13 = pnand %p801_p5, %p1280_p11  ;;  %s804_s13 = sshll.u32 %s929_s25, 4  ;;  %s805_s13 = int_to_ptr.vmem [resolvable:$false] %s804_s13 }
 0x1b7   : > { %s806_s18 = scalar_lea.vmem %s805_s13, 768  ;;  %p807_p2 = scmp.lt.s32.totalorder %s1188_s20, %s805_s13 }
 0x1b8   : > { %p803_p0 = pneg %p802_p13  ;;  %p808_p4 = scmp.lt.s32.totalorder %s806_s18, %s800_s19 }
 0x1ba   : > { %p809_p6 = por %p808_p4, %p807_p2 }
 0x1bc   : > { %p810_p8 = pnand %p809_p6, %p803_p0 }
 0x1be   : > { %813 = shalt.err (!%p810_p8)
}
 0x1bf   : > { %s814_s0 = scalar_lea.hbm %s1186_s16, 384  ;;  %s818_s12 = scalar_lea.hbm %s1241_s3, 768 }
 0x1c0   : > { %p815_p9 = scmp.ne.s32.totalorder %s1186_s16, %s814_s0  ;;  %p819_p1 = scmp.lt.u32.totalorder %s1186_s16, %s1241_s3 }
 0x1c1   : > { %p820_p3 = scmp.lt.u32.totalorder %s818_s12, %s814_s0  ;;  %p822_p5 = scmp.lt.u32.totalorder %s814_s0, %s1186_s16 }
 0x1c2   : > { %p816_p10 = pnand %p815_p9, %p1280_p11 }
 0x1c3   : > { %p821_p7 = por %p820_p3, %p819_p1 }
 0x1c4   : > { %p817_p12 = pneg %p816_p10 }
 0x1c5   : > { %p823_p13 = por %p822_p5, %p821_p7 }
 0x1c7   : > { %p824_p0 = pnand %p823_p13, %p817_p12 }
 0x1c9   : > { %827 = shalt.err (!%p824_p0)
}
 0x1ca   : > { %s930_s9 = smov 128   ;;  %s931_s2 = smov 8  }
 0x1cb   : > { %611 = dma.vmem_to_hbm [thread:$0]  (%p1280_p11), %s1188_s20, 384, %s1186_s16, %s1192_s10, %s930_s9, %s930_s9, %s931_s2  }
 0x1cc PF: > { %s1281_s22 = sld [smem:[#allocation23_spill]]  ;;  %s1282_s24 = sld [smem:[#allocation20_spill]] }
 0x1cd   : > { %s1283_s26 = sld [smem:[#allocation25_spill]] }
 0x1d2   : > { %p623_p2 = scmp.ge.s32.totalorder %s1281_s22, 2  ;;  %s372_s27 = sand.u32 1, %s1282_s24  }
 0x1d3   : > { %p1284_p4 = scmp.ne.s32.totalorder %s1283_s26, 0  ;;  %s373_s29 = scalar_lea.sflag [#allocation8], %s372_s27 }
 0x1d5   : > { %p618_p6 = pnand %p623_p2, %p1284_p4 }
 0x1d7   : > { %877 = dma.done.wait (!%p618_p6), %s373_s29, 384  }
 0x1d8   : > { %879 = vsyncadd (!%p618_p6), %s373_s29, 4294966912  ;;  %s21_s27 = sadd.s32 1, %s1281_s22   ;;  %s1285_s6 = sld [smem:[#allocation21_spill]] }
 0x1d9   : > { %p18_p8 = scmp.ge.s32.totalorder %s21_s27, 4   ;;  %s1286_s24 = sld [smem:[#allocation26_spill]] }
 0x1da   : > { %s1287_s25 = sld [smem:[#allocation22_spill]]  ;;  %s1288_s26 = sld [smem:[#allocation24_spill]] }
 0x1db   : > { %s1289_s22 = smov %s886_s23  ;;  %20 = sbr.rel (!%p18_p8) target bundleno = 17 (0x11), region = 155 }
 0x1de   : > { %s1290_s23 = smov %s1285_s6 }
 0x1e2   :  { %378 = vsyncpa [#allocation7], 1 }
 0x1e3   :  { %380 = vsyncpa [#allocation7 + $0x1], 1 }
 0x1e4   :  { %381 = vsyncpa [#allocation8], 1 }
 0x1e5   :  { %383 = vsyncpa [#allocation8 + $0x1], 1 }
 0x1e6   :  { %384 = vsyncmov [#allocation3] }
 0x1e9   :  { %s385_s4 = vpop.sfrf %384 }
 0x1ea   :  { %p501_p11 = scmp.ne.s32.totalorder %s385_s4, 0 }
 0x1ec   :  { %389 = shalt.err (%p501_p11)  }
 0x1ed   :  { %391 = vsyncmov [#allocation3 + $0x1] }
 0x1f0   :  { %s392_s7 = vpop.sfrf %391 }
 0x1f1   :  { %p502_p9 = scmp.ne.s32.totalorder %s392_s7, 0 }
 0x1f3   :  { %396 = shalt.err (%p502_p9)  }

</bundles_post_ra>
